<compile_context>
chip_gen: v7x
topology: tpu7x:2x2x1
jax: 0.10.0
libtpu: 0.0.40
codegen_flags: <defaults>
</compile_context>

<pallas_src>
import jax
import jax.numpy as jnp
from jax.experimental import pallas as pl
from jax.experimental.pallas import tpu as pltpu


def random_net_kernel(theta_ref, u_ref, logits_ref, baseline_ref, action_ref):
    # theta_ref : (1, A)  f32, VMEM
    # u_ref     : (1, TB) f32, VMEM  (uniform [0, 1) per row, lane-dense)
    # logits_ref: (TB, A) f32
    # baseline_ref, action_ref: (1, TB) lane-dense
    A = theta_ref.shape[1]
    TB = logits_ref.shape[0]

    # zeros = theta * 0 (keeps NaN/Inf propagation parity with torch)
    zeros = theta_ref[...] * 0.0                                  # (1, A)
    logits_ref[...] = jnp.broadcast_to(zeros, (TB, A))            # (TB, A)

    # baseline = sum over action dim; identical for every row.
    row_sum = jnp.sum(zeros, axis=1, keepdims=True)               # (1, 1)
    baseline_ref[...] = jnp.broadcast_to(row_sum, (1, TB))        # (1, TB)

    # softmax(zeros) is exactly uniform -> inverse-CDF sample is floor(u * A).
    # Pure VPU: one mul, one floor/cast, one min.  No MXU / EUP / XLU work.
    u = u_ref[...]                                                # (1, TB)
    action = jnp.floor(u * jnp.float32(A)).astype(jnp.int32)
    action_ref[...] = jnp.minimum(action, A - 1)                  # (1, TB)


def random_net_forward(theta, observation, core_state, *, rng_key):
    """Mirrors RandomNet.forward(inputs, core_state)."""
    T, B = observation.shape[0], observation.shape[1]
    A = theta.shape[0]
    TB = T * B

    theta2 = theta.reshape(1, A).astype(jnp.float32)
    # Lane-dense uniforms, one per (t, b) row.  Generated outside the kernel
    # (portable across real TPU and interpret mode); distributionally
    # equivalent to torch.multinomial's sampling.
    u = jax.random.uniform(rng_key, (1, TB), dtype=jnp.float32)

    out_shapes = (
        jax.ShapeDtypeStruct((TB, A), jnp.float32),   # policy_logits (flat)
        jax.ShapeDtypeStruct((1, TB), jnp.float32),   # baseline (lane-dense)
        jax.ShapeDtypeStruct((1, TB), jnp.int32),     # action (lane-dense)
    )

    # Single pallas_call, full-array blocks: at these sizes the kernel is
    # launch/DMA-overhead bound, so no grid/tiling is used.
    # TODO(synk): for realistic T*B (>~10k rows) tile the TB dimension with a
    # grid and mark it "parallel" for megacore sharding.
    logits, baseline, action = pl.pallas_call(
        random_net_kernel,
        out_shape=out_shapes,
        in_specs=[
            pl.BlockSpec(memory_space=pltpu.MemorySpace.VMEM),   # theta (1, A)
            pl.BlockSpec(memory_space=pltpu.MemorySpace.VMEM),   # uniforms (1, TB)
        ],
        out_specs=(
            pl.BlockSpec(memory_space=pltpu.MemorySpace.VMEM),
            pl.BlockSpec(memory_space=pltpu.MemorySpace.VMEM),
            pl.BlockSpec(memory_space=pltpu.MemorySpace.VMEM),
        ),
    )(theta2, u)

    policy_logits = logits.reshape(T, B, A)
    baseline = baseline.reshape(T, B)      # == .sum(dim=1).view(-1, B)
    action = action.reshape(T, B)
    return dict(policy_logits=policy_logits, baseline=baseline, action=action), core_state


if __name__ == "__main__":
    # Small shapes consistent with the module's forward: observation (T, B, H, W)
    T, B, H, W = 4, 2, 16, 16
    num_actions = 6

    key = jax.random.PRNGKey(0)
    key_obs, key_sample = jax.random.split(key)

    # Module initializes theta to zeros.
    theta = jnp.zeros((num_actions,), dtype=jnp.float32)
    # Observation values are ignored by the forward (only its shape is used).
    observation = jax.random.randint(key_obs, (T, B, H, W), 0, 256, dtype=jnp.int32)
    core_state = ()  # initial_state(batch_size) returns ()

    (out, new_core_state) = random_net_forward(
        theta, observation, core_state, rng_key=key_sample)
    out = jax.tree_util.tree_map(jax.block_until_ready, out)

    # Sanity checks mirroring the torch semantics.
    assert out["policy_logits"].shape == (T, B, num_actions)
    assert out["baseline"].shape == (T, B)
    assert out["action"].shape == (T, B)
    assert bool(jnp.all(out["policy_logits"] == 0.0))
    assert bool(jnp.all(out["baseline"] == 0.0))
    assert bool(jnp.all((out["action"] >= 0) & (out["action"] < num_actions)))
    assert new_core_state == ()

    print("KERNEL_OK")
</pallas_src>

<mosaic_0001>
module attributes {stable_mosaic.version = 11 : i64} {
  func.func @random_net_kernel(%arg0: memref<1x6xf32, #tpu.memory_space<vmem>>, %arg1: memref<1x8xf32, #tpu.memory_space<vmem>>, %arg2: memref<8x6xf32, #tpu.memory_space<vmem>>, %arg3: memref<1x8xf32, #tpu.memory_space<vmem>>, %arg4: memref<1x8xi32, #tpu.memory_space<vmem>>) attributes {dimension_semantics = [], scalar_prefetch = 0 : i64, scratch_operands = 0 : i64, tpu.core_type = #tpu.core_type<tc>} {
    %c0 = arith.constant 0 : index
    %c0_0 = arith.constant 0 : index
    %0 = vector.load %arg0[%c0, %c0_0] : memref<1x6xf32, #tpu.memory_space<vmem>>, vector<1x6xf32>
    %cst = arith.constant 0.000000e+00 : f32
    %1 = vector.broadcast %cst : f32 to vector<1x6xf32>
    %2 = arith.mulf %0, %1 : vector<1x6xf32>
    %3 = vector.shape_cast %2 : vector<1x6xf32> to vector<1x6xf32>
    %4 = vector.broadcast %3 : vector<1x6xf32> to vector<8x6xf32>
    %c0_1 = arith.constant 0 : index
    %c0_2 = arith.constant 0 : index
    %5 = vector.load %arg2[%c0_1, %c0_2] : memref<8x6xf32, #tpu.memory_space<vmem>>, vector<8x6xf32>
    tpu.vector_store %arg2[%c0_1, %c0_2], %4 {strides = array<i32>} : memref<8x6xf32, #tpu.memory_space<vmem>>, vector<8x6xf32>,
    %cst_3 = arith.constant dense<0.000000e+00> : vector<1xf32>
    %6 = vector.multi_reduction <add>, %2, %cst_3 [1] : vector<1x6xf32> to vector<1xf32>
    %7 = vector.shape_cast %6 : vector<1xf32> to vector<1x1xf32>
    %8 = vector.shape_cast %7 : vector<1x1xf32> to vector<1x1xf32>
    %9 = vector.broadcast %8 : vector<1x1xf32> to vector<1x8xf32>
    %c0_4 = arith.constant 0 : index
    %c0_5 = arith.constant 0 : index
    %10 = vector.load %arg3[%c0_4, %c0_5] : memref<1x8xf32, #tpu.memory_space<vmem>>, vector<1x8xf32>
    tpu.vector_store %arg3[%c0_4, %c0_5], %9 {strides = array<i32>} : memref<1x8xf32, #tpu.memory_space<vmem>>, vector<1x8xf32>,
    %c0_6 = arith.constant 0 : index
    %c0_7 = arith.constant 0 : index
    %11 = vector.load %arg1[%c0_6, %c0_7] : memref<1x8xf32, #tpu.memory_space<vmem>>, vector<1x8xf32>
    %cst_8 = arith.constant 6.000000e+00 : f32
    %12 = vector.broadcast %cst_8 : f32 to vector<1x8xf32>
    %13 = arith.mulf %11, %12 : vector<1x8xf32>
    %14 = math.floor %13 : vector<1x8xf32>
    %15 = arith.fptosi %14 : vector<1x8xf32> to vector<1x8xi32>
    %c5_i32 = arith.constant 5 : i32
    %16 = vector.broadcast %c5_i32 : i32 to vector<1x8xi32>
    %17 = arith.minsi %15, %16 : vector<1x8xi32>
    %c0_9 = arith.constant 0 : index
    %c0_10 = arith.constant 0 : index
    %18 = vector.load %arg4[%c0_9, %c0_10] : memref<1x8xi32, #tpu.memory_space<vmem>>, vector<1x8xi32>
    tpu.vector_store %arg4[%c0_9, %c0_10], %17 {strides = array<i32>} : memref<1x8xi32, #tpu.memory_space<vmem>>, vector<1x8xi32>,
    return
  }
}

</mosaic_0001>

<bundles_post_ra>
// kernel: tpu_custom_call.1
= control target key start
LH: loop header
LB: loop body
LE: loop exit
PB: predicated region body
PF: predicated region fallthrough
CT: control target
= control target key end

     0   :  { %10 = vsyncpa [#allocation3], 0  ;;  %s283_s0 = inlined_call_operand.hbm [shape: f32[1,6], index: 0, kind: input, shape index: {}]   ;;  %s284_s1 = inlined_call_operand.vmem [shape: f32[1,8], index: 1, kind: input, shape index: {}]   ;;  %s285_s2 = inlined_call_operand.hbm [shape: f32[8,6], index: 2, kind: output, shape index: {0}]   ;;  %s286_s3 = inlined_call_operand.hbm [shape: f32[1,8], index: 3, kind: output, shape index: {1}]   ;;  %s287_s4 = inlined_call_operand.hbm [shape: s32[1,8], index: 4, kind: output, shape index: {2}]  }
   0x1   :  { %11 = vsyncpa [#allocation4], 0 }
   0x2   :  { %12 = vsyncpa [#allocation7], 0  ;;  %s193_s15 = smov [#allocation2]   ;;  %s99_s19 = scalar_lea.hbm %s283_s0, 16 }
   0x3   :  { %s19_s16 = sshll.u32 %s193_s15, 4  ;;  %p100_p0 = scmp.ne.s32.totalorder %s283_s0, %s99_s19  ;;  %s20_s16 = int_to_ptr.vmem [resolvable:$true] %s19_s16 }
   0x4   :  { %p103_p1 = scmp.lt.u32.totalorder %s99_s19, %s283_s0 }
   0x6   :  { %p105_p2 = pnand %p103_p1, %p100_p0 }
   0x8   :  { %108 = shalt.err (!%p105_p2)
}
   0x9   :  { %s109_s24 = scalar_lea.vmem %s20_s16, 16  ;;  %s113_s25 = scalar_lea.vmem %s20_s16, 32 }
   0xa   :  { %p110_p3 = scmp.ne.s32.totalorder %s20_s16, %s109_s24  ;;  %p114_p4 = scmp.lt.s32.totalorder %s20_s16, %s20_s16 }
   0xb   :  { %p115_p5 = scmp.lt.s32.totalorder %s113_s25, %s109_s24 }
   0xd   :  { %p116_p6 = por %p115_p5, %p114_p4 }
   0xf   :  { %p117_p7 = pnand %p116_p6, %p110_p3 }
  0x11   :  { %120 = shalt.err (!%p117_p7)
}
  0x12   :  { %22 = dma.hbm_to_vmem [thread:$0]  %s283_s0, 16, %s20_s16, [#allocation3]  }
  0x13   :  { %187 = dma.done.wait [#allocation3], 16  }
  0x14   :  { %188 = vsyncadd [#allocation3], 4294967280  ;;  %v28_v0 = vld [vmem:[#allocation2] sm:$0x1]  ;;  %vm38_vm0 = vcmask 40960   ;;  %v31_v2 = vlaneseq  ;;  %vm42_vm1 = vcmask 57344  }
  0x15   :  { %v29_v1 = vmul.f32 0.0, %v28_v0  ;;  %v44_v5 = vld [vmem:[%s284_s1] sm:$0x1]  ;;  %vm36_vm3 = vcmask 48128   ;;  %s194_s0 = smov [#allocation5]  }
  0x16   :  { %v32_v4 = vshrl.u32 %v31_v2, 7  ;;  %v45_v6 = vmul.f32 6.0, %v44_v5  ;;  %s57_s30 = sshll.u32 %s194_s0, 4  ;;  %s58_s30 = int_to_ptr.vmem [resolvable:$true] %s57_s30 }
  0x17   :  { %v39_v3 = vsel %vm38_vm0, %v29_v1, 0.0  ;;  %s121_s5 = scalar_lea.vmem %s58_s30, 128  ;;  %p126_p9 = scmp.lt.s32.totalorder %s58_s30, %s58_s30 }
  0x18   :  { %40 = vadd.xlane.f32.xlu0 %v39_v3  ;;  %v33_v7 = vsub.s32 0, %v32_v4  ;;  %v46_v8 = vfloor.f32 %v45_v6  ;;  %p122_p8 = scmp.ne.s32.totalorder %s58_s30, %s121_s5  ;;  %p127_p10 = scmp.lt.s32.totalorder %s121_s5, %s121_s5 }
  0x1a   :  { %v93_v9 = vtrunc.f32 %v46_v8  ;;  %v34_v10 = vrot.slane %v29_v1, %v33_v7  ;;  %p128_p11 = por %p127_p10, %p126_p9 }
  0x1c   :  { %v94_v11 = vcvt.f32.s32 %v93_v9  ;;  %37 = vst.msk [vmem:[#allocation5] sm:$0xff] %vm36_vm3, %v34_v10  ;;  %p129_p12 = pnand %p128_p11, %p122_p8 }
  0x1e   :  { %vm48_vm2 = vcmp.lt.s32.totalorder %v94_v11, 5 }
  0x1f   :  { %v49_v12 = vsel %vm48_vm2, %v94_v11, 5 }
  0x20   :  { %50 = vst.msk [vmem:[#allocation8] sm:$0x1] %vm42_vm1, %v49_v12 }
  0x21   :  { %132 = shalt.err (!%p129_p12)
}
  0x22   :  { %s133_s7 = scalar_lea.hbm %s285_s2, 128 }
  0x23   :  { %p134_p13 = scmp.ne.s32.totalorder %s285_s2, %s133_s7  ;;  %p137_p0 = scmp.lt.u32.totalorder %s133_s7, %s285_s2 }
  0x25   :  { %p139_p1 = pnand %p137_p0, %p134_p13 }
  0x27   :  { %142 = shalt.err (!%p139_p1)
}
  0x28   :  { %60 = dma.vmem_to_hbm [thread:$0]  %s58_s30, 128, %s285_s2, [#allocation4]  }
  0x29   :  { %s195_s14 = smov [#allocation6]   ;;  %s196_s16 = smov [#allocation8]  }
  0x2a   :  { %s67_s15 = sshll.u32 %s195_s14, 4  ;;  %s77_s17 = sshll.u32 %s196_s16, 4  ;;  %s68_s15 = int_to_ptr.vmem [resolvable:$true] %s67_s15  ;;  %s250_s17 = int_to_ptr.vmem [resolvable:$true] %s77_s17 }
  0x2b   :  { %s143_s18 = scalar_lea.vmem %s68_s15, 16  ;;  %s147_s19 = scalar_lea.vmem %s68_s15, 32 }
  0x2c   :  { %p144_p2 = scmp.ne.s32.totalorder %s68_s15, %s143_s18  ;;  %p148_p3 = scmp.lt.s32.totalorder %s68_s15, %s68_s15 }
  0x2d   :  { %p149_p4 = scmp.lt.s32.totalorder %s147_s19, %s143_s18 }
  0x2f   :  { %p150_p5 = por %p149_p4, %p148_p3 }
  0x31   :  { %p151_p6 = pnand %p150_p5, %p144_p2 }
  0xa5   :  { %v41_v13 = vpop.xlane.xlu0 %40 }
  0xa6   :  { %43 = vst.msk [vmem:[#allocation6] sm:$0x1] %vm42_vm1, %v41_v13 }
  0xa7   :  { %154 = shalt.err (!%p151_p6)
}
  0xa8   :  { %s155_s21 = scalar_lea.hbm %s286_s3, 16 }
  0xa9   :  { %p156_p7 = scmp.ne.s32.totalorder %s286_s3, %s155_s21  ;;  %p159_p8 = scmp.lt.u32.totalorder %s155_s21, %s286_s3 }
  0xab   :  { %p161_p9 = pnand %p159_p8, %p156_p7 }
  0xad   :  { %164 = shalt.err (!%p161_p9)
}
  0xae   :  { %70 = dma.vmem_to_hbm [thread:$0]  %s68_s15, 16, %s286_s3, [#allocation7]  }
  0xaf   :  { %s165_s28 = scalar_lea.vmem %s250_s17, 16  ;;  %s169_s29 = scalar_lea.vmem %s250_s17, 32 }
  0xb0   :  { %p166_p10 = scmp.ne.s32.totalorder %s250_s17, %s165_s28  ;;  %p170_p11 = scmp.lt.s32.totalorder %s250_s17, %s250_s17 }
  0xb1   :  { %p171_p12 = scmp.lt.s32.totalorder %s169_s29, %s165_s28 }
  0xb3   :  { %p172_p13 = por %p171_p12, %p170_p11 }
  0xb5   :  { %p173_p0 = pnand %p172_p13, %p166_p10 }
  0xb7   :  { %176 = shalt.err (!%p173_p0)
}
  0xb8   :  { %s177_s5 = scalar_lea.hbm %s287_s4, 16 }
  0xb9   :  { %p178_p1 = scmp.ne.s32.totalorder %s287_s4, %s177_s5  ;;  %p181_p2 = scmp.lt.u32.totalorder %s177_s5, %s287_s4 }
  0xbb   :  { %p183_p3 = pnand %p181_p2, %p178_p1 }
  0xbd   :  { %186 = shalt.err (!%p183_p3)
}
  0xbe   :  { %80 = dma.vmem_to_hbm [thread:$0]  %s250_s17, 16, %s287_s4, [#allocation7]  }
  0xbf   :  { %189 = dma.done.wait [#allocation4], 128  }
  0xc0   :  { %190 = vsyncadd [#allocation4], 4294967168 }
  0xc1   :  { %191 = dma.done.wait [#allocation7], 32  }
  0xc2   :  { %192 = vsyncadd [#allocation7], 4294967264 }
  0xc3   :  { %90 = vsyncpa [#allocation3], 1 }
  0xc4   :  { %91 = vsyncpa [#allocation4], 1 }
  0xc5   :  { %92 = vsyncpa [#allocation7], 1 }

</bundles_post_ra>
